<compile_context>
chip_gen: v6e
topology: v6e:2x2x1
jax: 0.10.0
libtpu: 0.0.40
codegen_flags: <defaults>
</compile_context>

<pallas_src>
import functools

import jax
import jax.numpy as jnp
from jax.experimental import pallas as pl
from jax.experimental.pallas import tpu as pltpu


# ----------------------------- kernel body -----------------------------


def _layernorm_kernel(x_ref, a_ref, b_ref, o_ref, *, eps, d_model, use_mxu):
    # x_ref: (block_rows, d_model), a_ref/b_ref: (1, d_model) float32
    x = x_ref[...].astype(jnp.float32)

    if use_mxu:
        # Offload the two cross-lane reductions to the (otherwise idle) MXU:
        # row sums as matmuls against a ones column.  Two-pass (x - mean)
        # form kept for numerical stability / parity with torch.
        ones_col = jnp.ones((d_model, 1), dtype=jnp.float32)
        row_sum = jnp.dot(x, ones_col, preferred_element_type=jnp.float32)
        mean = row_sum * jnp.float32(1.0 / d_model)
        diff = x - mean
        sq_sum = jnp.dot(diff * diff, ones_col,
                         preferred_element_type=jnp.float32)
        var = sq_sum * jnp.float32(1.0 / (d_model - 1))
    else:
        # HBM-bound generations (v5e): plain VPU/XLU reductions are free under
        # the DMA time; keep the simple path.
        mean = jnp.mean(x, axis=-1, keepdims=True)
        diff = x - mean
        # unbiased standard deviation (torch.std default: N-1 denominator)
        # NOTE: d_model == 1 divides by zero, same as torch.std (returns nan).
        var = jnp.sum(diff * diff, axis=-1, keepdims=True) * jnp.float32(
            1.0 / (d_model - 1)
        )

    std = jnp.sqrt(var)
    # Narrow (rows, 1) column reciprocal, then broadcasted VPU multiplies.
    # approx=False: exact reciprocal (Newton/divide); kept exact so the 1e-5
    # tolerance vs the torch reference is guaranteed.
    inv = pl.reciprocal(std + jnp.float32(eps), approx=False)
    a = a_ref[...]
    b = b_ref[...]
    y = diff * inv * a + b
    o_ref[...] = y.astype(o_ref.dtype)


# --------------------------- tiling heuristics ---------------------------


def _round_down(v, m):
    return (v // m) * m


def _device_kind():
    try:
        return jax.devices()[0].device_kind.lower()
    except Exception:  # pragma: no cover - defensive only
        return ""


def _vmem_capacity_bytes():
    try:
        return int(pltpu.get_tpu_info().vmem_capacity_bytes)
    except Exception:  # pragma: no cover - conservative fallback (v7x size)
        return 64 << 20


def _generation_config():
    """Per-generation knobs: (use_mxu_reductions, min_grid_steps, vmem caps)."""
    kind = _device_kind()
    capacity = _vmem_capacity_bytes()
    # ~75% of physical VMEM as the Mosaic scoped limit; leaves headroom for
    # internal scratch / semaphores / double-buffer rounding on v7x.
    vmem_limit = max(16 << 20, int(capacity * 3 // 4))
    # Per-grid-step tile budget: half the scoped limit, capped at 28 MiB.
    tile_budget = min(28 << 20, vmem_limit // 2)

    is_v7 = "v7" in kind
    # v5e (and older) are cleanly HBM-bound -> keep plain VPU/XLU reductions.
    is_old = any(tag in kind for tag in ("v2", "v3", "v4", "v5"))
    use_mxu = not is_old
    # 2 TCs x 2 buffers on v7x; single TC elsewhere only needs double-buffer.
    min_grid_steps = 4 if is_v7 else 2
    return use_mxu, min_grid_steps, vmem_limit, tile_budget


def _pick_block_rows(rows, d_model, itemsize, tile_budget_bytes, min_grid_steps):
    """Largest row tile fitting the VMEM budget, keeping a few grid steps."""
    # sublane multiple: 8 for f32, 16 for bf16, 32 for int8
    sub = max(8, 32 // max(itemsize, 1))
    # Per-row VMEM per grid step:
    #   2 in-buffers + 2 out-buffers in native dtype (double buffering)
    #   + ~1 materialized f32 temporary of the tile (the upcast/diff tile).
    per_row_bytes = d_model * (4 * itemsize + 4)
    br = max(sub, _round_down(tile_budget_bytes // per_row_bytes, sub))
    # Keep >= min_grid_steps for large inputs so megacore sharding and the
    # DMA double-buffer pipeline stay overlapped.
    if rows > min_grid_steps * sub:
        br = min(br, max(sub, _round_down(rows // min_grid_steps, sub)))
    # Never exceed the (sublane-rounded-up) row count.
    br = min(br, ((rows + sub - 1) // sub) * sub)
    return br


# ------------------------------- wrapper -------------------------------


def sublayer_forward(x, a1, b1, *, eps=1e-6, block_rows=None):
    """Apply LayerNorm (then dropout-as-identity, eval mode) row-wise.

    x  : (batch, seq, d_model)
    a1 : (d_model,)  scale
    b1 : (d_model,)  bias
    """
    batch, seq, d_model = x.shape
    rows = batch * seq
    x2 = x.reshape(rows, d_model)
    # Pre-cast scale/bias to the compute dtype (float32); constant index_map
    # means they stay VMEM-resident across the whole grid.
    a2 = a1.reshape(1, d_model).astype(jnp.float32)
    b2 = b1.reshape(1, d_model).astype(jnp.float32)

    use_mxu, min_steps, vmem_limit, tile_budget = _generation_config()

    if block_rows is None:
        block_rows = _pick_block_rows(
            rows, d_model, x.dtype.itemsize, tile_budget, min_steps
        )
    grid = (pl.cdiv(rows, block_rows),)

    kernel = functools.partial(
        _layernorm_kernel, eps=eps, d_model=d_model, use_mxu=use_mxu
    )

    out2 = pl.pallas_call(
        kernel,
        out_shape=jax.ShapeDtypeStruct((rows, d_model), x.dtype),
        grid_spec=pltpu.PrefetchScalarGridSpec(
            num_scalar_prefetch=0,
            grid=grid,
            in_specs=[
                pl.BlockSpec((block_rows, d_model), lambda i: (i, 0)),
                pl.BlockSpec((1, d_model), lambda i: (0, 0)),
                pl.BlockSpec((1, d_model), lambda i: (0, 0)),
            ],
            out_specs=pl.BlockSpec((block_rows, d_model), lambda i: (i, 0)),
        ),
        compiler_params=pltpu.CompilerParams(
            dimension_semantics=("parallel",),
            vmem_limit_bytes=int(vmem_limit),
        ),
    )(x2, a2, b2)

    # dropout in eval mode is identity (and the reference forward is a stub).
    return out2.reshape(batch, seq, d_model)


# ------------------------------ reference ------------------------------


def _reference(x, a1, b1, eps=1e-6):
    # pure-JAX reference matching the PyTorch LayerNorm exactly
    x32 = x.astype(jnp.float32)
    mean = jnp.mean(x32, axis=-1, keepdims=True)
    diff = x32 - mean
    d = x32.shape[-1]
    var = jnp.sum(diff * diff, axis=-1, keepdims=True) / (d - 1)
    std = jnp.sqrt(var)
    return (a1 * diff / (std + eps) + b1).astype(x.dtype)


if __name__ == "__main__":
    key = jax.random.PRNGKey(0)
    # d_model kept a multiple of 128 so the lane axis is dense.
    batch, seq, d_model = 2, 8, 128

    x = jax.random.normal(key, (batch, seq, d_model), dtype=jnp.float32)
    # deterministic parameter init, matching LayerNorm.__init__
    a1 = jnp.ones((d_model,), dtype=jnp.float32)
    b1 = jnp.zeros((d_model,), dtype=jnp.float32)

    out = sublayer_forward(x, a1, b1)
    out = jax.block_until_ready(out)

    ref = _reference(x, a1, b1)
    assert out.shape == (batch, seq, d_model)
    assert jnp.allclose(out, ref, atol=1e-5, rtol=1e-5), "mismatch vs reference"

    print("KERNEL_OK")
</pallas_src>

<mosaic_0001>
module attributes {stable_mosaic.version = 11 : i64} {
  func.func @_layernorm_kernel(%arg0: i32, %arg1: memref<16x128xf32, #tpu.memory_space<vmem>>, %arg2: memref<1x128xf32, #tpu.memory_space<vmem>>, %arg3: memref<1x128xf32, #tpu.memory_space<vmem>>, %arg4: memref<16x128xf32, #tpu.memory_space<vmem>>) attributes {dimension_semantics = [#tpu.dimension_semantics<parallel>], iteration_bounds = array<i64: 1>, scalar_prefetch = 0 : i64, scratch_operands = 0 : i64, tpu.core_type = #tpu.core_type<tc>, window_params = [{transform_indices = @transform_0, window_bounds = array<i64: 16, 128>}, {pipeline_mode = #tpu.pipeline_mode<synchronous>, transform_indices = @transform_1, window_bounds = array<i64: 1, 128>}, {pipeline_mode = #tpu.pipeline_mode<synchronous>, transform_indices = @transform_2, window_bounds = array<i64: 1, 128>}, {transform_indices = @transform_3, window_bounds = array<i64: 16, 128>}]} {
    %c0 = arith.constant 0 : index
    %c0_0 = arith.constant 0 : index
    %0 = vector.load %arg1[%c0, %c0_0] : memref<16x128xf32, #tpu.memory_space<vmem>>, vector<16x128xf32>
    %cst = arith.constant 1.000000e+00 : f32
    %1 = vector.broadcast %cst : f32 to vector<128x1xf32>
    %cst_1 = arith.constant dense<0.000000e+00> : vector<16x1xf32>
    %2 = tpu.matmul %0, %1, %cst_1 {dimension_numbers = #tpu.dot_dimension_numbers<[1], [0], [0], [1], [0, 0, 1, 1], [], []>} : vector<16x128xf32>, vector<128x1xf32>, vector<16x1xf32> -> vector<16x1xf32>
    %cst_2 = arith.constant 7.812500e-03 : f32
    %3 = vector.broadcast %cst_2 : f32 to vector<16x1xf32>
    %4 = arith.mulf %2, %3 : vector<16x1xf32>
    %5 = vector.broadcast %4 : vector<16x1xf32> to vector<16x128xf32>
    %6 = arith.subf %0, %5 : vector<16x128xf32>
    %7 = arith.mulf %6, %6 : vector<16x128xf32>
    %cst_3 = arith.constant dense<0.000000e+00> : vector<16x1xf32>
    %8 = tpu.matmul %7, %1, %cst_3 {dimension_numbers = #tpu.dot_dimension_numbers<[1], [0], [0], [1], [0, 0, 1, 1], [], []>} : vector<16x128xf32>, vector<128x1xf32>, vector<16x1xf32> -> vector<16x1xf32>
    %cst_4 = arith.constant 0.00787401571 : f32
    %9 = vector.broadcast %cst_4 : f32 to vector<16x1xf32>
    %10 = arith.mulf %8, %9 : vector<16x1xf32>
    %11 = math.sqrt %10 : vector<16x1xf32>
    %cst_5 = arith.constant 9.99999997E-7 : f32
    %12 = vector.broadcast %cst_5 : f32 to vector<16x1xf32>
    %13 = arith.addf %11, %12 : vector<16x1xf32>
    %14 = tpu.reciprocal %13 : vector<16x1xf32> -> vector<16x1xf32>
    %c0_6 = arith.constant 0 : index
    %c0_7 = arith.constant 0 : index
    %15 = vector.load %arg2[%c0_6, %c0_7] : memref<1x128xf32, #tpu.memory_space<vmem>>, vector<1x128xf32>
    %c0_8 = arith.constant 0 : index
    %c0_9 = arith.constant 0 : index
    %16 = vector.load %arg3[%c0_8, %c0_9] : memref<1x128xf32, #tpu.memory_space<vmem>>, vector<1x128xf32>
    %17 = vector.broadcast %14 : vector<16x1xf32> to vector<16x128xf32>
    %18 = arith.mulf %6, %17 : vector<16x128xf32>
    %19 = vector.broadcast %15 : vector<1x128xf32> to vector<16x128xf32>
    %20 = arith.mulf %18, %19 : vector<16x128xf32>
    %21 = vector.broadcast %16 : vector<1x128xf32> to vector<16x128xf32>
    %22 = arith.addf %20, %21 : vector<16x128xf32>
    %c0_10 = arith.constant 0 : index
    %c0_11 = arith.constant 0 : index
    %23 = vector.load %arg4[%c0_10, %c0_11] : memref<16x128xf32, #tpu.memory_space<vmem>>, vector<16x128xf32>
    tpu.vector_store %arg4[%c0_10, %c0_11], %22 {strides = array<i32>} : memref<16x128xf32, #tpu.memory_space<vmem>>, vector<16x128xf32>,
    return
  }
  func.func @transform_0(%arg0: i32) -> (i32, i32) {
    %c0_i32 = arith.constant 0 : i32
    %c0_i32_0 = arith.constant 0 : i32
    return %arg0, %c0_i32 : i32, i32
  }
  func.func @transform_1(%arg0: i32) -> (i32, i32) {
    %c0_i32 = arith.constant 0 : i32
    %c0_i32_0 = arith.constant 0 : i32
    %c0_i32_1 = arith.constant 0 : i32
    return %c0_i32, %c0_i32_0 : i32, i32
  }
  func.func @transform_2(%arg0: i32) -> (i32, i32) {
    %c0_i32 = arith.constant 0 : i32
    %c0_i32_0 = arith.constant 0 : i32
    %c0_i32_1 = arith.constant 0 : i32
    return %c0_i32, %c0_i32_0 : i32, i32
  }
  func.func @transform_3(%arg0: i32) -> (i32, i32) {
    %c0_i32 = arith.constant 0 : i32
    %c0_i32_0 = arith.constant 0 : i32
    return %arg0, %c0_i32 : i32, i32
  }
}

</mosaic_0001>

<bundles_post_ra>
// kernel: tpu_custom_call.1
= control target key start
LH: loop header
LB: loop body
LE: loop exit
PB: predicated region body
PF: predicated region fallthrough
CT: control target
= control target key end

     0   :  { %8 = vsyncpa [#allocation3], 0  ;;  %s546_s0 = inlined_call_operand.hbm [shape: f32[16,128], index: 0, kind: input, shape index: {}]   ;;  %s547_s1 = inlined_call_operand.vmem [shape: f32[1,128], index: 1, kind: input, shape index: {}]   ;;  %s548_s2 = inlined_call_operand.vmem [shape: f32[1,128], index: 2, kind: input, shape index: {}]   ;;  %s549_s3 = inlined_call_operand.hbm [shape: f32[16,128], index: 3, kind: output, shape index: {}]  }
   0x1   :  { %9 = vsyncpa [#allocation4], 0  ;;  %s434_s12 = smov [#allocation2]  }
   0x2   :  { %s15_s13 = sshll.u32 %s434_s12, 4  ;;  %s16_s13 = int_to_ptr.vmem [resolvable:$true] %s15_s13 }
   0x3   :  { %s398_s14 = scalar_lea.vmem %s16_s13, 256  ;;  %p403_p1 = scmp.lt.s32.totalorder %s16_s13, %s16_s13 }
   0x4   :  { %p399_p0 = scmp.ne.s32.totalorder %s16_s13, %s398_s14  ;;  %p404_p2 = scmp.lt.s32.totalorder %s398_s14, %s398_s14 }
   0x6   :  { %p405_p3 = por %p404_p2, %p403_p1 }
   0x8   :  { %p406_p4 = pnand %p405_p3, %p399_p0 }
   0xa   :  { %409 = shalt.err (!%p406_p4)
}
   0xb   :  { %s435_s15 = smov 128   ;;  %s436_s16 = smov 8  }
   0xc   :  { %21 = dma.hbm_to_vmem [thread:$0]  %s546_s0, 256, %s16_s13, [#allocation3], %s435_s15, %s435_s15, %s436_s16  }
   0xd   :  { %430 = dma.done.wait [#allocation3], 256  }
   0xe   :  { %431 = vsyncadd [#allocation3], 4294967040  ;;  %v437_v0 = vmov 1.0   ;;  %v479_v1 = vld [vmem:[#allocation2] sm:$0xff]  ;;  %v30_v2 = vld [vmem:[#allocation2 + $0x8] sm:$0xff]  ;;  %v438_v3 = vmov 0  }
   0xf   :  { %304 = vmatprep.subr.mxu0 %v437_v0  ;;  %339 = vmatprep.subr.mxu1 %v437_v0  ;;  %v266_v32 = vld [vmem:[%s547_s1] ss:$0 sm:$0xff]  ;;  %s439_s22 = smov [#allocation5]  }
  0x10   :  { %305 = vmatpush3.msra.mxu0 %v437_v0  ;;  %340 = vmatpush3.msra.mxu1 %v437_v0  ;;  %v267_v35 = vld [vmem:[%s548_s2] ss:$0 sm:$0xff]  ;;  %s254_s23 = sshll.u32 %s439_s22, 4  ;;  %s255_s23 = int_to_ptr.vmem [resolvable:$true] %s254_s23 }
  0x11   :  { %306 = vmatprep.subr.mxu0 %v437_v0  ;;  %341 = vmatprep.subr.mxu1 %v437_v0  ;;  %s410_s24 = scalar_lea.vmem %s255_s23, 256  ;;  %p415_p6 = scmp.lt.s32.totalorder %s255_s23, %s255_s23 }
  0x12   :  { %307 = vmatpush3.msra.mxu0 %v437_v0  ;;  %342 = vmatpush3.msra.mxu1 %v437_v0  ;;  %p411_p5 = scmp.ne.s32.totalorder %s255_s23, %s410_s24  ;;  %p416_p7 = scmp.lt.s32.totalorder %s410_s24, %s410_s24 }
  0x13   :  { %308 = vmatprep.subr.mxu0 %v437_v0  ;;  %343 = vmatprep.subr.mxu1 %v437_v0 }
  0x14   :  { %309 = vmatpush3.msra.mxu0 %v437_v0  ;;  %344 = vmatpush3.msra.mxu1 %v437_v0  ;;  %p417_p8 = por %p416_p7, %p415_p6 }
  0x15   :  { %310 = vmatprep.subr.mxu0 %v437_v0  ;;  %345 = vmatprep.subr.mxu1 %v437_v0 }
  0x16   :  { %311 = vmatpush3.msra.mxu0 %v437_v0  ;;  %336 = vmatprep.mubr.f32.mxu0 %v479_v1  ;;  %p418_p9 = pnand %p417_p8, %p411_p5 }
  0x17   :  { %312 = vmatprep.subr.mxu0 %v437_v0  ;;  %346 = vmatpush3.msra.mxu1 %v437_v0 }
  0x18   :  { %313 = vmatpush3.msra.mxu0 %v437_v0  ;;  %347 = vmatprep.subr.mxu1 %v437_v0 }
  0x19   :  { %314 = vmatprep.subr.mxu0 %v437_v0  ;;  %348 = vmatpush3.msra.mxu1 %v437_v0 }
  0x1a   :  { %315 = vmatpush3.msra.mxu0 %v437_v0  ;;  %349 = vmatprep.subr.mxu1 %v437_v0 }
  0x1b   :  { %316 = vmatprep.subr.mxu0 %v437_v0  ;;  %350 = vmatpush3.msra.mxu1 %v437_v0 }
  0x1c   :  { %317 = vmatpush3.msra.mxu0 %v437_v0  ;;  %351 = vmatprep.subr.mxu1 %v437_v0 }
  0x1d   :  { %318 = vmatprep.subr.mxu0 %v437_v0  ;;  %352 = vmatpush3.msra.mxu1 %v437_v0 }
  0x1e   :  { %319 = vmatpush3.msra.mxu0 %v437_v0  ;;  %353 = vmatprep.subr.mxu1 %v437_v0 }
  0x1f   :  { %320 = vmatprep.subr.mxu0 %v437_v0  ;;  %354 = vmatpush3.msra.mxu1 %v437_v0 }
  0x20   :  { %321 = vmatpush3.msra.mxu0 %v437_v0  ;;  %355 = vmatprep.subr.mxu1 %v437_v0 }
  0x21   :  { %322 = vmatprep.subr.mxu0 %v437_v0  ;;  %356 = vmatpush3.msra.mxu1 %v437_v0 }
  0x22   :  { %323 = vmatpush3.msra.mxu0 %v437_v0  ;;  %357 = vmatprep.subr.mxu1 %v437_v0 }
  0x23   :  { %324 = vmatprep.subr.mxu0 %v437_v0  ;;  %358 = vmatpush3.msra.mxu1 %v437_v0 }
  0x24   :  { %325 = vmatpush3.msra.mxu0 %v437_v0  ;;  %359 = vmatprep.subr.mxu1 %v437_v0 }
  0x25   :  { %326 = vmatprep.subr.mxu0 %v437_v0  ;;  %360 = vmatpush3.msra.mxu1 %v437_v0 }
  0x26   :  { %327 = vmatpush3.msra.mxu0 %v437_v0  ;;  %361 = vmatprep.subr.mxu1 %v437_v0 }
  0x27   :  { %328 = vmatprep.subr.mxu0 %v437_v0  ;;  %362 = vmatpush3.msra.mxu1 %v437_v0 }
  0x28   :  { %329 = vmatpush3.msra.mxu0 %v437_v0  ;;  %363 = vmatprep.subr.mxu1 %v437_v0 }
  0x29   :  { %330 = vmatprep.subr.mxu0 %v437_v0  ;;  %364 = vmatpush3.msra.mxu1 %v437_v0 }
  0x2a   :  { %331 = vmatpush3.msra.mxu0 %v437_v0  ;;  %365 = vmatprep.subr.mxu1 %v437_v0 }
  0x2b   :  { %332 = vmatprep.subr.mxu0 %v437_v0  ;;  %366 = vmatpush3.msra.mxu1 %v437_v0 }
  0x2c   :  { %333 = vmatpush3.msra.mxu0 %v437_v0  ;;  %367 = vmatprep.subr.mxu1 %v437_v0 }
  0x2d   :  { %334 = vmatprep.subr.mxu0 %v437_v0  ;;  %368 = vmatpush3.msra.mxu1 %v437_v0 }
  0x2e   :  { %335 = vmatpush3.msra.mxu0 %v437_v0  ;;  %369 = vmatprep.subr.mxu1 %v437_v0 }
  0x2f   :  { %337 = vmatmul.mubr.f32.vlgmr.msra.gmra.mxu0 %v30_v2  ;;  %370 = vmatpush3.msra.mxu1 %v437_v0 }
  0x30   :  { %380 = vset.pattern.permute.xlu0 %v438_v3  ;;  %381 = vset.pattern.permute.xlu1 %v438_v3 }
  0xef   :  { %v338_v4 = vpop.f32.mrf.mxu0 }
  0xf0   :  { %v107_v7 = vmul.f32 0.0078125, %v338_v4 }
  0xf1   :  { %v97_v5 = vpop.f32.mrf.mxu0 }
  0xf2   :  { %v106_v6 = vmul.f32 0.0078125, %v97_v5 }
  0xf4   :  { %110 = vperm.xlu0 %380, %v106_v6  }
  0xf8   :  { %115 = vperm.xlu0 %380, %v107_v7  }
 0x16f   :  { %v111_v8 = vpop.permute.xlu0 %110 }
 0x170   :  { %v118_v9 = vsub.f32 %v479_v1, %v111_v8 }
 0x172   :  { %v120_v10 = vmul.f32 %v118_v9, %v118_v9 }
 0x173   :  { %v116_v11 = vpop.permute.xlu0 %115 }
 0x174   :  { %v119_v12 = vsub.f32 %v30_v2, %v116_v11  ;;  %371 = vmatprep.mubr.f32.mxu1 %v120_v10 }
 0x176   :  { %v121_v13 = vmul.f32 %v119_v12, %v119_v12 }
 0x178   :  { %372 = vmatmul.mubr.f32.vlgmr.msra.gmra.mxu1 %v121_v13 }
 0x238   :  { %v373_v14 = vpop.f32.mrf.mxu1 }
 0x239   :  { %v198_v15 = vmul.f32 0.007874016, %v373_v14 }
 0x23a   :  { %v188_v16 = vpop.f32.mrf.mxu1 }
 0x23b   :  { %382 = vrsqrt.f32 %v198_v15  ;;  %v197_v17 = vmul.f32 0.007874016, %v188_v16  ;;  %vm208_vm0 = vcmp.eq.f32.partialorder %v198_v15, inf  ;;  %v211_v23 = vand.u32 2147483648, %v198_v15 }
 0x23c   :  { %vm210_vm2 = vcmp.eq.f32.partialorder %v198_v15, 0.0 }
 0x23d   :  { %384 = vrsqrt.f32 %v197_v17  ;;  %vm201_vm1 = vcmp.eq.f32.partialorder %v197_v17, inf  ;;  %v204_v24 = vand.u32 2147483648, %v197_v17  ;;  %vm203_vm3 = vcmp.eq.f32.partialorder %v197_v17, 0.0 }
 0x248   :  { %v383_v18 = vpop.eup %382 }
 0x249   :  { %v207_v19 = vmul.f32 %v383_v18, %v198_v15 }
 0x24a   :  { %v385_v20 = vpop.eup %384 }
 0x24b   :  { %v209_v21 = vsel %vm208_vm0, %v198_v15, %v207_v19  ;;  %v200_v22 = vmul.f32 %v385_v20, %v197_v17 }
 0x24c   :  { %v212_v26 = vsel %vm210_vm2, %v211_v23, %v209_v21 }
 0x24d   :  { %v202_v25 = vsel %vm201_vm1, %v197_v17, %v200_v22  ;;  %v214_v29 = vadd.f32 1e-06, %v212_v26 }
 0x24e   :  { %v205_v27 = vsel %vm203_vm3, %v204_v24, %v202_v25 }
 0x24f   :  { %v213_v28 = vadd.f32 1e-06, %v205_v27 }
 0x251   :  { %386 = vrcp.f32 %v213_v28 }
 0x252   :  { %388 = vrcp.f32 %v214_v29 }
 0x25e   :  { %v387_v30 = vpop.eup %386 }
 0x25f   :  { %221 = vperm.xlu1 %381, %v387_v30   ;;  %v389_v31 = vpop.eup %388 }
 0x263   :  { %226 = vperm.xlu1 %381, %v389_v31  }
 0x2da   :  { %v222_v33 = vpop.permute.xlu1 %221 }
 0x2db   :  { %v229_v34 = vmul.f32 %v222_v33, %v118_v9 }
 0x2dd   :  { %v237_v36 = vmul.f32 %v266_v32, %v229_v34 }
 0x2de   :  { %v227_v37 = vpop.permute.xlu1 %226 }
 0x2df   :  { %v245_v38 = vadd.f32 %v267_v35, %v237_v36  ;;  %v230_v39 = vmul.f32 %v227_v37, %v119_v12 }
 0x2e1   :  { %247 = vst [vmem:[#allocation5] sm:$0xff] %v245_v38  ;;  %v238_v40 = vmul.f32 %v266_v32, %v230_v39 }
 0x2e3   :  { %v246_v41 = vadd.f32 %v267_v35, %v238_v40 }
 0x2e5   :  { %248 = vst [vmem:[#allocation5 + $0x8] sm:$0xff] %v246_v41 }
 0x2e6   :  { %421 = shalt.err (!%p418_p9)
}
 0x2e7   :  { %260 = dma.vmem_to_hbm [thread:$0]  %s255_s23, 256, %s549_s3, [#allocation4], %s435_s15, %s435_s15, %s436_s16  }
 0x2e8   :  { %432 = dma.done.wait [#allocation4], 256  }
 0x2e9   :  { %433 = vsyncadd [#allocation4], 4294967040 }
 0x2ea   :  { %264 = vsyncpa [#allocation3], 1 }
 0x2eb   :  { %265 = vsyncpa [#allocation4], 1 }

</bundles_post_ra>
